<compile_context>
chip_gen: v6e
topology: v6e:2x2x1
jax: 0.10.0
libtpu: 0.0.40
codegen_flags: <defaults>
</compile_context>

<pallas_src>
import jax
import jax.numpy as jnp
from jax.experimental import pallas as pl
from jax.experimental.pallas import tpu as pltpu


LANES = 1024                    # lane-dense f32 row width: 8 sublanes * 128 lanes
PALLAS_MIN_ELEMS = 256 * 1024   # below this, fused XLA beats kernel-launch overhead


def _round_up(x, m):
    return ((x + m - 1) // m) * m


def _cdiv(a, b):
    return -(-a // b)


def _tpu_config():
    """(max_tile_rows, vmem_limit_bytes, min_grid_steps) tuned per TPU generation."""
    vmem_bytes = 0
    try:
        info = pltpu.get_tpu_info()
        vmem_bytes = int(getattr(info, "vmem_capacity_bytes", 0) or 0)
    except Exception:
        vmem_bytes = 0
    if vmem_bytes >= 96 * 1024 * 1024:
        # v5e / v6e: 128 MiB VMEM, single TensorCore. Big tiles amortize the
        # ~0.35 us/step overhead; 4 streams x 2 bufs x 8 MiB = 64 MiB working set.
        return 2048, 96 * 1024 * 1024, 1
    # v7x (64 MiB VMEM per TC, 2 TensorCores) or unknown hardware: keep the
    # double-buffered working set at ~16 MiB and guarantee >= 2 grid steps so the
    # "parallel" axis can shard across both cores.
    return 512, 32 * 1024 * 1024, 2


def _grad_hess_kernel(scalars_ref, fx_grad_ref, hess2_ref, grad_out_ref, hess_out_ref):
    """Elementwise hot path of BaseGBModule._get_grad_hess_FX.

    grad = FX.grad * N
    hess = maximum(second_derivative_diag * N, min_hess)
    (the *N on the hessian comes from differentiating the already-scaled grad).
    N and min_hess live in SMEM so changing them never forces a recompile.
    """
    scale = scalars_ref[0]       # float32(N)
    min_hess = scalars_ref[1]
    grad_out_ref[...] = fx_grad_ref[...] * scale
    hess_out_ref[...] = jnp.maximum(hess2_ref[...] * scale, min_hess)


def _grad_hess_pallas(fx_flat, h2_flat, scalars, total):
    """Run the streaming kernel on lane-dense [rows, 1024] f32 views."""
    max_tile_rows, vmem_limit, min_steps = _tpu_config()

    rows = _cdiv(total, LANES)
    lane_pad = rows * LANES - total          # <= 1023 elements; 0 on the fast path
    if lane_pad:
        fx_flat = jnp.pad(fx_flat, (0, lane_pad))
        h2_flat = jnp.pad(h2_flat, (0, lane_pad))
    fx2d = fx_flat.reshape(rows, LANES)
    h22d = h2_flat.reshape(rows, LANES)

    # Tile: multiple of 8 sublanes, capped per generation; the ragged last block is
    # masked by Mosaic, so no tile-multiple padding or output crop is needed.
    tile = min(max_tile_rows, _round_up(rows, 8))
    if min_steps > 1:
        tile = min(tile, max(8, _round_up(_cdiv(rows, min_steps), 8)))
    grid = (_cdiv(rows, tile),)

    spec = pl.BlockSpec((tile, LANES), lambda i: (i, 0))
    smem_spec = pl.BlockSpec(memory_space=pltpu.MemorySpace.SMEM)

    grad2d, hess2d = pl.pallas_call(
        _grad_hess_kernel,
        out_shape=(
            jax.ShapeDtypeStruct((rows, LANES), jnp.float32),
            jax.ShapeDtypeStruct((rows, LANES), jnp.float32),
        ),
        grid=grid,
        in_specs=[smem_spec, spec, spec],
        out_specs=(spec, spec),
        input_output_aliases={1: 0, 2: 1},   # grad/hess reuse the input HBM buffers
        compiler_params=pltpu.CompilerParams(
            dimension_semantics=("parallel",),
            vmem_limit_bytes=vmem_limit,
        ),
        cost_estimate=pl.CostEstimate(
            flops=3 * total,                 # mul + mul + max per element
            transcendentals=0,
            bytes_accessed=16 * total,       # 8 B read + 8 B written per element
        ),
    )(scalars, fx2d, h22d)
    return grad2d, hess2d


def get_grad_hess_fx(fx_grad, hess2_diag, *, min_hess=0.0, force_pallas=False):
    """Mirror of BaseGBModule._get_grad_hess_FX tensor ops.

    fx_grad     : [N, D]  == FX.grad
    hess2_diag  : [N, D]  == d(sum(FX.grad[:, i])) / dFX [:, i]   (unscaled)
    returns (grad, hess), both [N, D] float32.
    """
    assert fx_grad.shape == hess2_diag.shape
    n, d = fx_grad.shape
    total = n * d

    fx32 = fx_grad.astype(jnp.float32)
    h232 = hess2_diag.astype(jnp.float32)

    # Small / medium inputs: a 3-flop / 16-byte streaming op is better left to XLA
    # (it fuses into the upstream HVP); the Pallas path only wins for many-MiB
    # streams.
    if total < PALLAS_MIN_ELEMS and not force_pallas:
        grad = fx32 * jnp.float32(n)
        hess = jnp.maximum(h232 * jnp.float32(n), jnp.float32(min_hess))
        return grad, hess

    scalars = jnp.array([float(n), float(min_hess)], dtype=jnp.float32)
    grad2d, hess2d = _grad_hess_pallas(fx32.reshape(-1), h232.reshape(-1),
                                       scalars, total)

    if total % LANES == 0:
        # zero-copy fast path: plain metadata reshape back to [N, D]
        return grad2d.reshape(n, d), hess2d.reshape(n, d)
    grad = grad2d.reshape(-1)[:total].reshape(n, d)
    hess = hess2d.reshape(-1)[:total].reshape(n, d)
    return grad, hess


if __name__ == "__main__":
    key = jax.random.PRNGKey(0)
    N, D = 256, 8  # batch rows, output_dim (small; N*D % 1024 == 0 -> zero-copy path)
    k1, k2 = jax.random.split(key)

    # FX: current boosted predictions (the leaf-parameter tensor in the module)
    FX = jax.random.normal(k1, (N, D), dtype=jnp.float32)
    y = jax.random.normal(k2, (N, D), dtype=jnp.float32)

    # Concrete scalar objective (stand-in for the abstract forward's loss) so that
    # FX has a gradient, exactly as loss.backward() would populate FX.grad.
    def loss_fn(fx):
        return jnp.mean((fx - y) ** 2)

    grad_fn = jax.grad(loss_fn)

    # === glue: autodiff (equivalent of FX.grad and torch.autograd.grad(...)) ===
    fx_grad = grad_fn(FX)  # == FX.grad

    # Per-column second-derivative diagonal via ONE vmapped HVP (forward-over-
    # reverse) instead of D separate double-backward passes:
    #   hess2_diag[:, i] = d(sum_n FX.grad[n, i]) / dFX [:, i]
    def hvp(v):
        return jax.jvp(grad_fn, (FX,), (v,))[1]

    col_basis = jnp.broadcast_to(jnp.eye(D, dtype=jnp.float32)[:, None, :], (D, N, D))
    hvps = jax.vmap(hvp)(col_basis)                     # [D, N, D]; hvps[i] = H @ e_i
    hess2_diag = jnp.diagonal(hvps, axis1=0, axis2=2)   # [N, D]: hvps[i, :, i]

    # === Pallas kernel: grad = FX.grad * N ; hess = max(hess2 * N, min_hess) ===
    min_hess = 0.0  # note: BaseGBModule.__init__ hard-codes self.min_hess = 0.0
    # force_pallas=True: the demo is (deliberately) below the XLA-fallback
    # threshold, but we still exercise the kernel once here.
    grad, hess = get_grad_hess_fx(fx_grad, hess2_diag, min_hess=min_hess,
                                  force_pallas=True)
    jax.block_until_ready((grad, hess))

    # reference check (pure JAX, mirrors the PyTorch expressions)
    ref_grad = fx_grad * N
    ref_hess = jnp.maximum(hess2_diag * N, jnp.float32(min_hess))
    assert grad.shape == (N, D) and hess.shape == (N, D)
    assert jnp.allclose(grad, ref_grad, atol=1e-6), "grad mismatch"
    assert jnp.allclose(hess, ref_hess, atol=1e-6), "hess mismatch"
    # analytic sanity check for MSE: d2L/dFX^2 diag == 2 / (N*D)
    assert jnp.allclose(hess2_diag, 2.0 / (N * D), atol=1e-6), "hvp glue mismatch"

    print("KERNEL_OK")
</pallas_src>

<mosaic_0001>
module attributes {stable_mosaic.version = 11 : i64} {
  func.func @_grad_hess_kernel(%arg0: i32, %arg1: memref<2xf32, #tpu.memory_space<smem>>, %arg2: memref<8x1024xf32, #tpu.memory_space<vmem>>, %arg3: memref<8x1024xf32, #tpu.memory_space<vmem>>, %arg4: memref<8x1024xf32, #tpu.memory_space<vmem>>, %arg5: memref<8x1024xf32, #tpu.memory_space<vmem>>) attributes {dimension_semantics = [#tpu.dimension_semantics<parallel>], iteration_bounds = array<i64: 1>, scalar_prefetch = 0 : i64, scratch_operands = 0 : i64, tpu.core_type = #tpu.core_type<tc>, window_params = [{transform_indices = @transform_0, window_bounds = array<i64: 2>}, {transform_indices = @transform_1, window_bounds = array<i64: 8, 1024>}, {transform_indices = @transform_2, window_bounds = array<i64: 8, 1024>}, {transform_indices = @transform_3, window_bounds = array<i64: 8, 1024>}, {transform_indices = @transform_4, window_bounds = array<i64: 8, 1024>}]} {
    %c0 = arith.constant 0 : index
    %0 = memref.load %arg1[%c0] : memref<2xf32, #tpu.memory_space<smem>>
    %c1 = arith.constant 1 : index
    %1 = memref.load %arg1[%c1] : memref<2xf32, #tpu.memory_space<smem>>
    %c0_0 = arith.constant 0 : index
    %c0_1 = arith.constant 0 : index
    %2 = vector.load %arg2[%c0_0, %c0_1] : memref<8x1024xf32, #tpu.memory_space<vmem>>, vector<8x1024xf32>
    %3 = vector.broadcast %0 : f32 to vector<8x1024xf32>
    %4 = arith.mulf %2, %3 : vector<8x1024xf32>
    %c0_2 = arith.constant 0 : index
    %c0_3 = arith.constant 0 : index
    %5 = vector.load %arg4[%c0_2, %c0_3] : memref<8x1024xf32, #tpu.memory_space<vmem>>, vector<8x1024xf32>
    tpu.vector_store %arg4[%c0_2, %c0_3], %4 {strides = array<i32>} : memref<8x1024xf32, #tpu.memory_space<vmem>>, vector<8x1024xf32>,
    %c0_4 = arith.constant 0 : index
    %c0_5 = arith.constant 0 : index
    %6 = vector.load %arg3[%c0_4, %c0_5] : memref<8x1024xf32, #tpu.memory_space<vmem>>, vector<8x1024xf32>
    %7 = vector.broadcast %0 : f32 to vector<8x1024xf32>
    %8 = arith.mulf %6, %7 : vector<8x1024xf32>
    %9 = vector.broadcast %1 : f32 to vector<8x1024xf32>
    %10 = arith.maximumf %8, %9 : vector<8x1024xf32>
    %c0_6 = arith.constant 0 : index
    %c0_7 = arith.constant 0 : index
    %11 = vector.load %arg5[%c0_6, %c0_7] : memref<8x1024xf32, #tpu.memory_space<vmem>>, vector<8x1024xf32>
    tpu.vector_store %arg5[%c0_6, %c0_7], %10 {strides = array<i32>} : memref<8x1024xf32, #tpu.memory_space<vmem>>, vector<8x1024xf32>,
    return
  }
  func.func @transform_0(%arg0: i32) -> i32 {
    %c0_i32 = arith.constant 0 : i32
    %c0_i32_0 = arith.constant 0 : i32
    return %c0_i32 : i32
  }
  func.func @transform_1(%arg0: i32) -> (i32, i32) {
    %c0_i32 = arith.constant 0 : i32
    %c0_i32_0 = arith.constant 0 : i32
    return %arg0, %c0_i32 : i32, i32
  }
  func.func @transform_2(%arg0: i32) -> (i32, i32) {
    %c0_i32 = arith.constant 0 : i32
    %c0_i32_0 = arith.constant 0 : i32
    return %arg0, %c0_i32 : i32, i32
  }
  func.func @transform_3(%arg0: i32) -> (i32, i32) {
    %c0_i32 = arith.constant 0 : i32
    %c0_i32_0 = arith.constant 0 : i32
    return %arg0, %c0_i32 : i32, i32
  }
  func.func @transform_4(%arg0: i32) -> (i32, i32) {
    %c0_i32 = arith.constant 0 : i32
    %c0_i32_0 = arith.constant 0 : i32
    return %arg0, %c0_i32 : i32, i32
  }
}

</mosaic_0001>

<bundles_post_ra>
// kernel: tpu_custom_call.1
= control target key start
LH: loop header
LB: loop body
LE: loop exit
PB: predicated region body
PF: predicated region fallthrough
CT: control target
= control target key end

     0   :  { %10 = vsyncpa [#allocation5], 0  ;;  %s326_s0 = inlined_call_operand.vmem [shape: f32[2], index: 0, kind: input, shape index: {}]   ;;  %s327_s1 = inlined_call_operand.hbm [shape: f32[2,1024], index: 1, kind: input, shape index: {}, may-alias: {1,3}]   ;;  %s328_s2 = inlined_call_operand.hbm [shape: f32[2,1024], index: 2, kind: input, shape index: {}, may-alias: {2,4}]   ;;  %s329_s3 = inlined_call_operand.hbm [shape: f32[2,1024], index: 3, kind: output, shape index: {0}, may-alias: {1,3}]   ;;  %s330_s4 = inlined_call_operand.hbm [shape: f32[2,1024], index: 4, kind: output, shape index: {1}, may-alias: {2,4}]  }
   0x1   :  { %11 = vsyncpa [#allocation3], 0 }
   0x2   :  { %12 = vsyncpa [#allocation8], 0 }
   0x3   :  { %13 = vsyncpa [#allocation4], 0 }
   0x4   :  { %14 = vsyncpa [#allocation11], 0  ;;  %s21_s17 = sshll.u32 %s326_s0, 4  ;;  %s22_s17 = int_to_ptr.vmem [resolvable:$true] %s21_s17 }
   0x5   :  { %s162_s18 = scalar_lea.vmem %s22_s17, 16  ;;  %p167_p1 = scmp.lt.s32.totalorder %s22_s17, %s22_s17 }
   0x6   :  { %p163_p0 = scmp.ne.s32.totalorder %s22_s17, %s162_s18  ;;  %p168_p2 = scmp.lt.s32.totalorder %s162_s18, %s162_s18 }
   0x8   :  { %p169_p3 = por %p168_p2, %p167_p1 }
   0xa   :  { %p170_p4 = pnand %p169_p3, %p163_p0 }
   0xc   :  { %173 = shalt.err (!%p170_p4)
}
   0xd   :  { %s264_s19 = smov [#allocation2]  }
   0xe   :  { %24 = dma.vmem_to_smem %s22_s17, 16, %s264_s19, [#allocation5]  }
   0xf   :  { %29 = vsyncadd [#allocation3], 768  ;;  %s265_s20 = smov [#allocation6]  }
  0x10   :  { %s30_s21 = sshll.u32 %s265_s20, 4  ;;  %s31_s21 = int_to_ptr.vmem [resolvable:$true] %s30_s21 }
  0x11   :  { %s182_s22 = scalar_lea.vmem %s31_s21, 256  ;;  %s186_s23 = scalar_lea.vmem %s31_s21, 1024 }
  0x12   :  { %p183_p5 = scmp.ne.s32.totalorder %s31_s21, %s182_s22  ;;  %p187_p6 = scmp.lt.s32.totalorder %s31_s21, %s31_s21 }
  0x13   :  { %p188_p7 = scmp.lt.s32.totalorder %s186_s23, %s182_s22 }
  0x15   :  { %p189_p8 = por %p188_p7, %p187_p6 }
  0x17   :  { %p190_p9 = pnand %p189_p8, %p183_p5 }
  0x19   :  { %193 = shalt.err (!%p190_p9)
}
  0x1a   :  { %s266_s0 = smov 256   ;;  %s267_s24 = smov 16  }
  0x1b   :  { %36 = dma.hbm_to_vmem [thread:$0]  %s327_s1, 256, %s31_s21, [#allocation3], %s266_s0, %s266_s0, %s267_s24  }
  0x1c   :  { %41 = vsyncadd [#allocation8], 768  ;;  %s268_s27 = smov [#allocation7]  }
  0x1d   :  { %s42_s28 = sshll.u32 %s268_s27, 4  ;;  %s43_s28 = int_to_ptr.vmem [resolvable:$true] %s42_s28 }
  0x1e   :  { %s202_s29 = scalar_lea.vmem %s43_s28, 256  ;;  %s206_s30 = scalar_lea.vmem %s43_s28, 1024 }
  0x1f   :  { %p203_p10 = scmp.ne.s32.totalorder %s43_s28, %s202_s29  ;;  %p207_p11 = scmp.lt.s32.totalorder %s43_s28, %s43_s28 }
  0x20   :  { %p208_p12 = scmp.lt.s32.totalorder %s206_s30, %s202_s29 }
  0x22   :  { %p209_p13 = por %p208_p12, %p207_p11 }
  0x24   :  { %p210_p0 = pnand %p209_p13, %p203_p10 }
  0x26   :  { %213 = shalt.err (!%p210_p0)
}
  0x27   :  { %48 = dma.hbm_to_vmem [thread:$0]  %s328_s2, 256, %s43_s28, [#allocation8], %s266_s0, %s266_s0, %s267_s24  }
  0x28   :  { %254 = dma.done.wait [#allocation5], 16  }
  0x29   :  { %255 = vsyncadd [#allocation5], 4294967280 }
  0x2a   :  { %256 = dma.done.wait [#allocation3], 1024  }
  0x2b   :  { %257 = vsyncadd [#allocation3], 4294966272 }
  0x2c   :  { %258 = dma.done.wait [#allocation8], 1024  }
  0x2d   :  { %259 = vsyncadd [#allocation8], 4294966272 }
  0x2e   :  { %58 = sfence }
  0x2f   :  { %s59_s1 = sld [smem:[#allocation2]]  ;;  %v61_v0 = vld [vmem:[#allocation6] sm:$0xff]  ;;  %v62_v1 = vld [vmem:[#allocation6 + $0x8] sm:$0xff]  ;;  %v63_v2 = vld [vmem:[#allocation6 + $0x10] sm:$0xff] }
  0x30   :  { %s311_s7 = sld [smem:[#allocation2 + $0x1]]  ;;  %v64_v3 = vld [vmem:[#allocation6 + $0x18] sm:$0xff]  ;;  %v65_v4 = vld [vmem:[#allocation6 + $0x20] sm:$0xff]  ;;  %v66_v5 = vld [vmem:[#allocation6 + $0x28] sm:$0xff] }
  0x31   :  { %v67_v6 = vld [vmem:[#allocation6 + $0x30] sm:$0xff]  ;;  %v68_v7 = vld [vmem:[#allocation6 + $0x38] sm:$0xff]  ;;  %v86_v8 = vld [vmem:[#allocation7] sm:$0xff] }
  0x32   :  { %v87_v10 = vld [vmem:[#allocation7 + $0x8] sm:$0xff]  ;;  %v88_v11 = vld [vmem:[#allocation7 + $0x10] sm:$0xff]  ;;  %v89_v12 = vld [vmem:[#allocation7 + $0x18] sm:$0xff] }
  0x33   :  { %v90_v17 = vld [vmem:[#allocation7 + $0x20] sm:$0xff]  ;;  %v91_v18 = vld [vmem:[#allocation7 + $0x28] sm:$0xff]  ;;  %v92_v19 = vld [vmem:[#allocation7 + $0x30] sm:$0xff] }
  0x34   :  { %v93_v24 = vld [vmem:[#allocation7 + $0x38] sm:$0xff] }
  0x35   :  { %v69_v9 = vstv %s59_s1 }
  0x36   :  { %v70_v13 = vmul.f32 %v69_v9, %v61_v0  ;;  %v71_v14 = vmul.f32 %v69_v9, %v62_v1  ;;  %v72_v15 = vmul.f32 %v69_v9, %v63_v2  ;;  %v73_v16 = vmul.f32 %v69_v9, %v64_v3 }
  0x37   :  { %v74_v20 = vmul.f32 %v69_v9, %v65_v4  ;;  %v75_v21 = vmul.f32 %v69_v9, %v66_v5  ;;  %v76_v22 = vmul.f32 %v69_v9, %v67_v6  ;;  %v77_v23 = vmul.f32 %v69_v9, %v68_v7 }
  0x38   :  { %78 = vst [vmem:[#allocation9] sm:$0xff] %v70_v13  ;;  %79 = vst [vmem:[#allocation9 + $0x8] sm:$0xff] %v71_v14  ;;  %v94_v25 = vmul.f32 %v86_v8, %v69_v9  ;;  %v102_v26 = vstv %s311_s7  ;;  %v95_v27 = vmul.f32 %v87_v10, %v69_v9  ;;  %v96_v28 = vmul.f32 %v88_v11, %v69_v9 }
  0x39   :  { %80 = vst [vmem:[#allocation9 + $0x10] sm:$0xff] %v72_v15  ;;  %81 = vst [vmem:[#allocation9 + $0x18] sm:$0xff] %v73_v16  ;;  %v97_v29 = vmul.f32 %v89_v12, %v69_v9  ;;  %v98_v30 = vmul.f32 %v90_v17, %v69_v9  ;;  %v99_v31 = vmul.f32 %v91_v18, %v69_v9 }
  0x3a   :  { %82 = vst [vmem:[#allocation9 + $0x20] sm:$0xff] %v74_v20  ;;  %83 = vst [vmem:[#allocation9 + $0x28] sm:$0xff] %v75_v21  ;;  %v100_v32 = vmul.f32 %v92_v19, %v69_v9  ;;  %v103_v33 = vmax.f32 %v94_v25, %v102_v26  ;;  %v104_v34 = vmax.f32 %v95_v27, %v102_v26 }
  0x3b   :  { %84 = vst [vmem:[#allocation9 + $0x30] sm:$0xff] %v76_v22  ;;  %85 = vst [vmem:[#allocation9 + $0x38] sm:$0xff] %v77_v23  ;;  %v105_v35 = vmax.f32 %v96_v28, %v102_v26  ;;  %v101_v36 = vmul.f32 %v93_v24, %v69_v9  ;;  %v106_v37 = vmax.f32 %v97_v29, %v102_v26 }
  0x3c   :  { %v107_v38 = vmax.f32 %v98_v30, %v102_v26  ;;  %v108_v39 = vmax.f32 %v99_v31, %v102_v26  ;;  %v109_v40 = vmax.f32 %v100_v32, %v102_v26  ;;  %111 = vst [vmem:[#allocation10] sm:$0xff] %v103_v33  ;;  %112 = vst [vmem:[#allocation10 + $0x8] sm:$0xff] %v104_v34 }
  0x3d   :  { %113 = vst [vmem:[#allocation10 + $0x10] sm:$0xff] %v105_v35  ;;  %v110_v41 = vmax.f32 %v101_v36, %v102_v26  ;;  %114 = vst [vmem:[#allocation10 + $0x18] sm:$0xff] %v106_v37 }
  0x3e   :  { %115 = vst [vmem:[#allocation10 + $0x20] sm:$0xff] %v107_v38  ;;  %116 = vst [vmem:[#allocation10 + $0x28] sm:$0xff] %v108_v39 }
  0x3f   :  { %117 = vst [vmem:[#allocation10 + $0x30] sm:$0xff] %v109_v40  ;;  %118 = vst [vmem:[#allocation10 + $0x38] sm:$0xff] %v110_v41 }
  0x40   :  { %123 = vsyncadd [#allocation4], 768  ;;  %s269_s2 = smov [#allocation9]  }
  0x41   :  { %s124_s8 = sshll.u32 %s269_s2, 4  ;;  %s125_s8 = int_to_ptr.vmem [resolvable:$true] %s124_s8 }
  0x42   :  { %s214_s9 = scalar_lea.vmem %s125_s8, 256  ;;  %s218_s10 = scalar_lea.vmem %s125_s8, 1024 }
  0x43   :  { %p215_p1 = scmp.ne.s32.totalorder %s125_s8, %s214_s9  ;;  %p219_p2 = scmp.lt.s32.totalorder %s125_s8, %s125_s8 }
  0x44   :  { %p220_p3 = scmp.lt.s32.totalorder %s218_s10, %s214_s9 }
  0x46   :  { %p221_p4 = por %p220_p3, %p219_p2 }
  0x48   :  { %p222_p5 = pnand %p221_p4, %p215_p1 }
  0x4a   :  { %225 = shalt.err (!%p222_p5)
}
  0x4b   :  { %130 = dma.vmem_to_hbm [thread:$0]  %s125_s8, 256, %s329_s3, [#allocation4], %s266_s0, %s266_s0, %s267_s24  }
  0x4c   :  { %135 = vsyncadd [#allocation11], 768  ;;  %s270_s13 = smov [#allocation10]  }
  0x4d   :  { %s136_s14 = sshll.u32 %s270_s13, 4  ;;  %s137_s14 = int_to_ptr.vmem [resolvable:$true] %s136_s14 }
  0x4e   :  { %s234_s15 = scalar_lea.vmem %s137_s14, 256  ;;  %s238_s16 = scalar_lea.vmem %s137_s14, 1024 }
  0x4f   :  { %p235_p6 = scmp.ne.s32.totalorder %s137_s14, %s234_s15  ;;  %p239_p7 = scmp.lt.s32.totalorder %s137_s14, %s137_s14 }
  0x50   :  { %p240_p8 = scmp.lt.s32.totalorder %s238_s16, %s234_s15 }
  0x52   :  { %p241_p9 = por %p240_p8, %p239_p7 }
  0x54   :  { %p242_p10 = pnand %p241_p9, %p235_p6 }
  0x56   :  { %245 = shalt.err (!%p242_p10)
}
  0x57   :  { %142 = dma.vmem_to_hbm [thread:$0]  %s137_s14, 256, %s330_s4, [#allocation11], %s266_s0, %s266_s0, %s267_s24  }
  0x58   :  { %260 = dma.done.wait [#allocation4], 1024  }
  0x59   :  { %261 = vsyncadd [#allocation4], 4294966272 }
  0x5a   :  { %262 = dma.done.wait [#allocation11], 1024  }
  0x5b   :  { %263 = vsyncadd [#allocation11], 4294966272 }
  0x5c   :  { %149 = vsyncpa [#allocation3], 1 }
  0x5d   :  { %150 = vsyncpa [#allocation8], 1 }
  0x5e   :  { %151 = vsyncpa [#allocation4], 1 }
  0x5f   :  { %152 = vsyncpa [#allocation11], 1 }
  0x60   :  { %153 = vsyncpa [#allocation5], 1 }

</bundles_post_ra>
